<compile_context>
chip_gen: v6e
topology: v6e:2x2x1
jax: 0.10.0
libtpu: 0.0.40
codegen_flags: <defaults>
</compile_context>

<pallas_src>
import jax
import jax.numpy as jnp
from jax.experimental import pallas as pl
from jax.experimental.pallas import tpu as pltpu


def _head_kernel(x_ref, w1t_ref, b1_ref, w2t_ref, b2_ref, o_ref):
    # x_ref  : (C,  T)   f32 input pixels (channels x spatial-tile)
    # w1t_ref: (Hid, C)  f32 1x1-conv #1 weights (transposed)
    # b1_ref : (Hid, 1)  f32
    # w2t_ref: (O,  Hid) f32 1x1-conv #2 weights (transposed), O = na*(5+nc)
    # b2_ref : (O,  1)   f32
    # o_ref  : (O,  T)   bf16 raw detections (f32 accumulation inside)
    x = x_ref[...]
    h = jnp.dot(w1t_ref[...], x, preferred_element_type=jnp.float32) + b1_ref[...]
    h = h * jax.nn.sigmoid(h)                       # SiLU (YOLO default activation)
    y = jnp.dot(w2t_ref[...], h, preferred_element_type=jnp.float32) + b2_ref[...]
    o_ref[...] = y.astype(o_ref.dtype)


def _pick_tile_hw(hw_pad, n, c, out_itemsize,
                  budget_bytes=12 * 1024 * 1024, cap=8192):
    """Largest multiple of 128 that divides hw_pad, under a VMEM working-set budget.

    Working set per lane = double-buffered f32 input tile + out tile (weights are
    negligible).  Caps at 8192 lanes; when N==1, forces >=2 spatial tiles so the
    parallel grid can occupy both TensorCores on v7x."""
    per_lane = 2 * (c * 4 + 18 * out_itemsize)  # conservative; O is small anyway
    max_by_vmem = max(128, (budget_bytes // per_lane) // 128 * 128)
    limit = min(hw_pad, cap, max_by_vmem)
    if n == 1 and hw_pad >= 256:
        limit = min(limit, hw_pad // 2)
    best = 128
    t = 128
    while t <= limit:
        if hw_pad % t == 0:
            best = t
        t += 128
    return best


def vehicle_head_pallas(features_nchw, w1, b1, w2, b2, *, out_dtype=jnp.bfloat16):
    """features_nchw: (N, C, H, W) float32.  w1:(C,Hid) b1:(1,Hid) w2:(Hid,O) b2:(1,O).

    Returns (N, O, H, W) `out_dtype` raw detections (O = na*(5+nc))."""
    N, C, H, W = features_nchw.shape
    Hid = w1.shape[1]
    O = w2.shape[1]
    HW = H * W
    HW_pad = ((HW + 127) // 128) * 128

    # Free reshape only; no wrapper-side dtype cast of the big feature map.
    x = features_nchw.reshape(N, C, HW)
    if HW_pad != HW:
        # Pad spatial axis so every block is lane-dense (multiple of 128).
        x = jnp.pad(x, ((0, 0), (0, 0), (0, HW_pad - HW)))

    w1t = jnp.transpose(w1).astype(jnp.float32)      # (Hid, C)  -- tiny
    w2t = jnp.transpose(w2).astype(jnp.float32)      # (O, Hid)  -- tiny
    b1c = jnp.transpose(b1).astype(jnp.float32)      # (Hid, 1)
    b2c = jnp.transpose(b2).astype(jnp.float32)      # (O, 1)

    out_itemsize = jnp.dtype(out_dtype).itemsize
    tile_hw = _pick_tile_hw(HW_pad, N, C, out_itemsize)
    grid = (N, HW_pad // tile_hw)

    flops = 2 * N * HW_pad * (C * Hid + Hid * O)
    bytes_accessed = (N * C * HW_pad * 4                    # f32 input
                      + N * O * HW_pad * out_itemsize       # bf16 output
                      + w1t.size * 4 + w2t.size * 4
                      + b1c.size * 4 + b2c.size * 4)

    out = pl.pallas_call(
        _head_kernel,
        out_shape=jax.ShapeDtypeStruct((N, O, HW_pad), out_dtype),
        grid=grid,
        in_specs=[
            pl.BlockSpec((None, C, tile_hw), lambda n, i: (n, 0, i)),
            pl.BlockSpec((Hid, C), lambda n, i: (0, 0)),     # VMEM-resident weights
            pl.BlockSpec((Hid, 1), lambda n, i: (0, 0)),
            pl.BlockSpec((O, Hid), lambda n, i: (0, 0)),
            pl.BlockSpec((O, 1), lambda n, i: (0, 0)),
        ],
        out_specs=pl.BlockSpec((None, O, tile_hw), lambda n, i: (n, 0, i)),
        compiler_params=pltpu.CompilerParams(
            dimension_semantics=("parallel", "parallel"),
            vmem_limit_bytes=32 * 1024 * 1024,   # safe on v5e/v6e/v7x; tiles use far less
        ),
        cost_estimate=pl.CostEstimate(
            flops=flops,
            transcendentals=N * HW_pad * Hid,   # sigmoid in SiLU
            bytes_accessed=bytes_accessed,
        ),
    )(x, w1t, b1c, w2t, b2c)

    if HW_pad != HW:
        out = out[..., :HW]
    return out.reshape(N, O, H, W)


def _reference(features_nchw, w1, b1, w2, b2):
    N, C, H, W = features_nchw.shape
    x = jnp.transpose(features_nchw, (0, 2, 3, 1)).reshape(-1, C)
    h = x @ w1 + b1
    h = h * jax.nn.sigmoid(h)
    y = h @ w2 + b2
    return jnp.transpose(y.reshape(N, H, W, -1), (0, 3, 1, 2))


if __name__ == "__main__":
    # Small deterministic shapes: batch=2, channels=4, spatial=16x16.
    N, C, H, W = 2, 4, 16, 16
    HIDDEN = 32
    NUM_ANCHORS, NUM_CLASSES = 3, 1          # vehicle-only head
    OUT = NUM_ANCHORS * (5 + NUM_CLASSES)    # = 18

    key = jax.random.PRNGKey(0)
    k_x, k_w1, k_b1, k_w2, k_b2 = jax.random.split(key, 5)

    features = jax.random.normal(k_x, (N, C, H, W), dtype=jnp.float32)
    w1 = jax.random.normal(k_w1, (C, HIDDEN), dtype=jnp.float32) * 0.1
    b1 = jax.random.normal(k_b1, (1, HIDDEN), dtype=jnp.float32) * 0.01
    w2 = jax.random.normal(k_w2, (HIDDEN, OUT), dtype=jnp.float32) * 0.1
    b2 = jax.random.normal(k_b2, (1, OUT), dtype=jnp.float32) * 0.01

    out = vehicle_head_pallas(features, w1, b1, w2, b2)
    out = jax.block_until_ready(out)

    ref = _reference(features, w1, b1, w2, b2)
    assert out.shape == (N, OUT, H, W), out.shape
    # f32 compute, bf16 output storage vs f32 reference -> bf16-rounding tolerance.
    assert jnp.allclose(out.astype(jnp.float32), ref, atol=2e-2, rtol=2e-2), \
        "mismatch vs reference"

    print("KERNEL_OK")
</pallas_src>

<mosaic_0001>
module attributes {stable_mosaic.version = 11 : i64} {
  func.func @_head_kernel(%arg0: i32, %arg1: i32, %arg2: memref<1x4x256xf32, #tpu.memory_space<vmem>>, %arg3: memref<32x4xf32, #tpu.memory_space<vmem>>, %arg4: memref<32x1xf32, #tpu.memory_space<vmem>>, %arg5: memref<18x32xf32, #tpu.memory_space<vmem>>, %arg6: memref<18x1xf32, #tpu.memory_space<vmem>>, %arg7: memref<1x18x256xbf16, #tpu.memory_space<vmem>>) attributes {dimension_semantics = [#tpu.dimension_semantics<parallel>, #tpu.dimension_semantics<parallel>], iteration_bounds = array<i64: 2, 1>, scalar_prefetch = 0 : i64, scratch_operands = 0 : i64, tpu.core_type = #tpu.core_type<tc>, window_params = [{transform_indices = @transform_0, window_bounds = array<i64: 1, 4, 256>}, {pipeline_mode = #tpu.pipeline_mode<synchronous>, transform_indices = @transform_1, window_bounds = array<i64: 32, 4>}, {pipeline_mode = #tpu.pipeline_mode<synchronous>, transform_indices = @transform_2, window_bounds = array<i64: 32, 1>}, {pipeline_mode = #tpu.pipeline_mode<synchronous>, transform_indices = @transform_3, window_bounds = array<i64: 18, 32>}, {pipeline_mode = #tpu.pipeline_mode<synchronous>, transform_indices = @transform_4, window_bounds = array<i64: 18, 1>}, {transform_indices = @transform_5, window_bounds = array<i64: 1, 18, 256>}]} {
    %c0 = arith.constant 0 : index
    %c0_0 = arith.constant 0 : index
    %c0_1 = arith.constant 0 : index
    %0 = vector.load %arg2[%c0, %c0_0, %c0_1] : memref<1x4x256xf32, #tpu.memory_space<vmem>>, vector<1x4x256xf32>
    %1 = vector.shape_cast %0 : vector<1x4x256xf32> to vector<4x256xf32>
    %c0_2 = arith.constant 0 : index
    %c0_3 = arith.constant 0 : index
    %2 = vector.load %arg3[%c0_2, %c0_3] : memref<32x4xf32, #tpu.memory_space<vmem>>, vector<32x4xf32>
    %cst = arith.constant dense<0.000000e+00> : vector<32x256xf32>
    %3 = tpu.matmul %2, %1, %cst {dimension_numbers = #tpu.dot_dimension_numbers<[1], [0], [0], [1], [0, 0, 1, 1], [], []>} : vector<32x4xf32>, vector<4x256xf32>, vector<32x256xf32> -> vector<32x256xf32>
    %c0_4 = arith.constant 0 : index
    %c0_5 = arith.constant 0 : index
    %4 = vector.load %arg4[%c0_4, %c0_5] : memref<32x1xf32, #tpu.memory_space<vmem>>, vector<32x1xf32>
    %5 = vector.broadcast %4 : vector<32x1xf32> to vector<32x256xf32>
    %6 = arith.addf %3, %5 : vector<32x256xf32>
    %7 = arith.negf %6 : vector<32x256xf32>
    %8 = math.exp %7 : vector<32x256xf32>
    %cst_6 = arith.constant 1.000000e+00 : f32
    %9 = vector.broadcast %cst_6 : f32 to vector<32x256xf32>
    %10 = arith.addf %9, %8 : vector<32x256xf32>
    %11 = arith.divf %9, %10 : vector<32x256xf32>
    %12 = arith.mulf %6, %11 : vector<32x256xf32>
    %c0_7 = arith.constant 0 : index
    %c0_8 = arith.constant 0 : index
    %13 = vector.load %arg5[%c0_7, %c0_8] : memref<18x32xf32, #tpu.memory_space<vmem>>, vector<18x32xf32>
    %cst_9 = arith.constant dense<0.000000e+00> : vector<18x256xf32>
    %14 = tpu.matmul %13, %12, %cst_9 {dimension_numbers = #tpu.dot_dimension_numbers<[1], [0], [0], [1], [0, 0, 1, 1], [], []>} : vector<18x32xf32>, vector<32x256xf32>, vector<18x256xf32> -> vector<18x256xf32>
    %c0_10 = arith.constant 0 : index
    %c0_11 = arith.constant 0 : index
    %15 = vector.load %arg6[%c0_10, %c0_11] : memref<18x1xf32, #tpu.memory_space<vmem>>, vector<18x1xf32>
    %16 = vector.broadcast %15 : vector<18x1xf32> to vector<18x256xf32>
    %17 = arith.addf %14, %16 : vector<18x256xf32>
    %18 = arith.truncf %17 : vector<18x256xf32> to vector<18x256xbf16>
    %c0_12 = arith.constant 0 : index
    %c0_13 = arith.constant 0 : index
    %c0_14 = arith.constant 0 : index
    %19 = vector.load %arg7[%c0_12, %c0_13, %c0_14] : memref<1x18x256xbf16, #tpu.memory_space<vmem>>, vector<1x18x256xbf16>
    %20 = vector.shape_cast %19 : vector<1x18x256xbf16> to vector<18x256xbf16>
    %21 = vector.shape_cast %18 : vector<18x256xbf16> to vector<1x18x256xbf16>
    tpu.vector_store %arg7[%c0_12, %c0_13, %c0_14], %21 {strides = array<i32>} : memref<1x18x256xbf16, #tpu.memory_space<vmem>>, vector<1x18x256xbf16>,
    return
  }
  func.func @transform_0(%arg0: i32, %arg1: i32) -> (i32, i32, i32) {
    %c0_i32 = arith.constant 0 : i32
    %c0_i32_0 = arith.constant 0 : i32
    return %arg0, %c0_i32, %arg1 : i32, i32, i32
  }
  func.func @transform_1(%arg0: i32, %arg1: i32) -> (i32, i32) {
    %c0_i32 = arith.constant 0 : i32
    %c0_i32_0 = arith.constant 0 : i32
    %c0_i32_1 = arith.constant 0 : i32
    return %c0_i32, %c0_i32_0 : i32, i32
  }
  func.func @transform_2(%arg0: i32, %arg1: i32) -> (i32, i32) {
    %c0_i32 = arith.constant 0 : i32
    %c0_i32_0 = arith.constant 0 : i32
    %c0_i32_1 = arith.constant 0 : i32
    return %c0_i32, %c0_i32_0 : i32, i32
  }
  func.func @transform_3(%arg0: i32, %arg1: i32) -> (i32, i32) {
    %c0_i32 = arith.constant 0 : i32
    %c0_i32_0 = arith.constant 0 : i32
    %c0_i32_1 = arith.constant 0 : i32
    return %c0_i32, %c0_i32_0 : i32, i32
  }
  func.func @transform_4(%arg0: i32, %arg1: i32) -> (i32, i32) {
    %c0_i32 = arith.constant 0 : i32
    %c0_i32_0 = arith.constant 0 : i32
    %c0_i32_1 = arith.constant 0 : i32
    return %c0_i32, %c0_i32_0 : i32, i32
  }
  func.func @transform_5(%arg0: i32, %arg1: i32) -> (i32, i32, i32) {
    %c0_i32 = arith.constant 0 : i32
    %c0_i32_0 = arith.constant 0 : i32
    return %arg0, %c0_i32, %arg1 : i32, i32, i32
  }
}

</mosaic_0001>

<bundles_post_ra>
// kernel: tpu_custom_call.1
= control target key start
LH: loop header
LB: loop body
LE: loop exit
PB: predicated region body
PF: predicated region fallthrough
CT: control target
= control target key end

     0   :  { %s834_s18 = smov 0   ;;  %s836_s19 = smov 0   ;;  %s940_s0 = inlined_call_operand.vmem [shape: f32[2,4,256], index: 0, kind: input, shape index: {}]   ;;  %s941_s1 = inlined_call_operand.vmem [shape: f32[32,4], index: 1, kind: input, shape index: {}]   ;;  %s942_s2 = inlined_call_operand.vmem [shape: f32[32,1], index: 2, kind: input, shape index: {}]   ;;  %s943_s3 = inlined_call_operand.vmem [shape: f32[18,32], index: 3, kind: input, shape index: {}]   ;;  %s944_s4 = inlined_call_operand.vmem [shape: f32[18,1], index: 4, kind: input, shape index: {}]   ;;  %s945_s5 = inlined_call_operand.vmem [shape: bf16[2,18,256], index: 5, kind: output, shape index: {}]  }
   0x1   :  { %s838_s20 = smov 0  }
   0x2 LB: > { %s27_s21 = sadd.s32 1, %s796_s19  ;;  %p686_p0 = scmp.ge.s32.totalorder %s800_s20, 1  ;;  %s800_s20 = sphi %s838_s20, %s15_s20   ;;  %s796_s19 = sphi %s836_s19, %s947_s19   ;;  %s792_s18 = sphi %s834_s18, %s946_s18  }
   0x3   : > { %p29_p1 = scmp.ge.s32.totalorder %s27_s21, 2  ;;  %p208_p2 = scmp.lt.s32.totalorder %s800_s20, 3 }
   0x5   : > { %s949_s21 = smov (%p29_p1, %s27_s21), 0  ;;  %p209_p3 = pnand %p686_p0, %p208_p2 }
   0x6   : > { %p245_p4 = scmp.lt.s32.totalorder (!%p209_p3), %s792_s18, 1 }
   0x7   : > { %212 = sbr.rel (%p209_p3) target bundleno = 480 (0x1e0), region = 40 }
   0xc   : > { %v802_v0 = vmov 0.0   ;;  %v270_v1 = vld [vmem:[%s942_s2 + $0x8] sm:$0xff]  ;;  %s951_s18 = smov (!%p245_p4, %s792_s18), 1  ;;  %v803_v2 = vmov 0   ;;  %v272_v3 = vld [vmem:[%s942_s2 + $0x18] sm:$0xff]  ;;  %v269_v4 = vld [vmem:[%s942_s2] sm:$0xff] }
   0xd   : > { %377 = vmatprep.mubr.f32.mxu0 %v802_v0  ;;  %553 = vmatprep.mubr.f32.mxu1 %v802_v0  ;;  %s712_s26 = sshll.u32 %s951_s18, 3  ;;  %v271_v5 = vld [vmem:[%s942_s2 + $0x10] sm:$0xff]  ;;  %vm308_vm0 = vcmask 1043456   ;;  %v265_v8 = vld [vmem:[%s941_s1] sm:$0xff]  ;;  %vm295_vm1 = vcmask 31744   ;;  %v462_v10 = vld [vmem:[%s944_s4 + $0x8] sm:$0xff] }
   0xe   : > { %744 = vset.pattern.permute.xlu1 %v803_v2  ;;  %743 = vset.pattern.permute.xlu0 %v803_v2  ;;  %s252_s8 = scalar_lea.vmem %s940_s0, %s712_s26  ;;  %v461_v9 = vld [vmem:[%s944_s4] sm:$0xff]  ;;  %v266_v11 = vld [vmem:[%s941_s1 + $0x8] sm:$0xff]  ;;  %v463_v12 = vld [vmem:[%s944_s4 + $0x10] sm:$0x3]  ;;  %vm479_vm2 = vcmask 261120  }
   0xf   : > { %280 = vperm.xlu1 %744, %v270_v1   ;;  %290 = vperm.xlu0 %743, %v272_v3   ;;  %v264_v6 = vld [vmem:[%s252_s8] sm:$0xff]  ;;  %v267_v13 = vld [vmem:[%s941_s1 + $0x10] sm:$0xff]  ;;  %v268_v14 = vld [vmem:[%s941_s1 + $0x18] sm:$0xff]  ;;  %s716_s8 = smul.u32 24, %s951_s18 }
  0x10   : > { %v294_v7 = vcombine.high %v264_v6, %v264_v6 }
  0x11   : > { %s262_s11 = scalar_lea.vmem %s945_s5, %s716_s8 }
  0x12   : > { %690 = vmatprep.subr.msk.mxu0 %vm308_vm0, %v294_v7 }
  0x13   : > { %275 = vperm.xlu1 %744, %v269_v4   ;;  %285 = vperm.xlu0 %743, %v271_v5  }
  0x14   : > { %691 = vmatpush1.msk.msra.mxu0 %vm308_vm0, %v264_v6 }
  0x15   : > { %692 = vmatmul.mubr.msk.f32.vlgmr.msra.gmra.mxu0 %vm295_vm1, %v265_v8 }
  0x16   : > { %383 = vmatprep.mubr.f32.mxu0 %v802_v0 }
  0x17   : > { %466 = vperm.xlu0 %743, %v461_v9   ;;  %471 = vperm.xlu1 %744, %v462_v10  }
  0x19   : > { %693 = vmatmul.mubr.msk.f32.gmra.mxu0 %vm295_vm1, %v266_v11 }
  0x1a   : > { %389 = vmatprep.mubr.f32.mxu0 %v802_v0 }
  0x1b   : > { %476 = vperm.xlu0 %743, %v463_v12   ;;  %v458_v12 = vld [vmem:[%s943_s3] sm:$0xff] }
  0x1d   : > { %694 = vmatmul.mubr.msk.f32.gmra.mxu0 %vm295_vm1, %v267_v13  ;;  %v459_v13 = vld [vmem:[%s943_s3 + $0x8] sm:$0xff] }
  0x1e   : > { %395 = vmatprep.mubr.f32.mxu0 %v802_v0 }
  0x21   : > { %695 = vmatmul.mubr.msk.f32.gmra.mxu0 %vm295_vm1, %v268_v14  ;;  %v460_v14 = vld [vmem:[%s943_s3 + $0x10] sm:$0x3] }
  0x8a   : > { %v281_v15 = vpop.permute.xlu1 %280  ;;  %v291_v17 = vpop.permute.xlu0 %290 }
  0x8e   : > { %v276_v19 = vpop.permute.xlu1 %275  ;;  %v286_v24 = vpop.permute.xlu0 %285 }
  0xd5   : > { %v379_v16 = vpop.f32.mrf.mxu0 }
  0xd6   : > { %v908_v32 = vadd.f32 %v379_v16, %v276_v19  ;;  %v467_v16 = vpop.permute.xlu0 %466 }
  0xd7   : > { %v381_v18 = vpop.f32.mrf.mxu0 }
  0xd8   : > { %v900_v21 = vadd.f32 %v381_v18, %v276_v19  ;;  %v696_v41 = vmul.f32 -1.442695, %v908_v32 }
  0xd9   : > { %v385_v20 = vpop.f32.mrf.mxu0 }
  0xda   : > { %v697_v26 = vmul.f32 -1.442695, %v900_v21  ;;  %v905_v28 = vadd.f32 %v385_v20, %v281_v15 }
  0xdb   : > { %v387_v22 = vpop.f32.mrf.mxu0 }
  0xdc   : > { %v902_v23 = vadd.f32 %v387_v22, %v281_v15  ;;  %746 = vpow2.f32 %v697_v26  ;;  %v698_v37 = vmul.f32 -1.442695, %v905_v28  ;;  %v472_v22 = vpop.permute.xlu1 %471 }
  0xdd   : > { %v391_v25 = vpop.f32.mrf.mxu0 }
  0xde   : > { %v392_v27 = vadd.f32 %v391_v25, %v286_v24  ;;  %v699_v29 = vmul.f32 -1.442695, %v902_v23 }
  0xdf   : > { %v393_v30 = vpop.f32.mrf.mxu0 }
  0xe0   : > { %v394_v31 = vadd.f32 %v393_v30, %v286_v24  ;;  %v700_v33 = vmul.f32 -1.442695, %v392_v27  ;;  %748 = vpow2.f32 %v699_v29 }
  0xe1   : > { %v397_v34 = vpop.f32.mrf.mxu0 }
  0xe2   : > { %v701_v35 = vmul.f32 -1.442695, %v394_v31  ;;  %v398_v36 = vadd.f32 %v397_v34, %v291_v17 }
  0xe3   : > { %v399_v38 = vpop.f32.mrf.mxu0 }
  0xe4   : > { %750 = vpow2.f32 %v701_v35  ;;  %v702_v39 = vmul.f32 -1.442695, %v398_v36  ;;  %v400_v40 = vadd.f32 %v399_v38, %v291_v17 }
  0xe5   : > { %752 = vpow2.f32 %v700_v33 }
  0xe6   : > { %754 = vpow2.f32 %v702_v39  ;;  %v703_v42 = vmul.f32 -1.442695, %v400_v40 }
  0xe7   : > { %756 = vpow2.f32 %v698_v37 }
  0xe8   : > { %758 = vpow2.f32 %v703_v42 }
  0xe9   : > { %760 = vpow2.f32 %v696_v41  ;;  %v747_v43 = vpop.eup %746 }
  0xea   : > { %v427_v57 = vadd.f32 1.0, %v747_v43 }
  0xed   : > { %v749_v44 = vpop.eup %748 }
  0xee   : > { %v429_v54 = vadd.f32 1.0, %v749_v44 }
  0xf1   : > { %v751_v45 = vpop.eup %750 }
  0xf2   : > { %v753_v46 = vpop.eup %752  ;;  %v431_v47 = vadd.f32 1.0, %v751_v45 }
  0xf3   : > { %v755_v48 = vpop.eup %754  ;;  %v430_v52 = vadd.f32 1.0, %v753_v46 }
  0xf4   : > { %v757_v49 = vpop.eup %756  ;;  %v432_v50 = vadd.f32 1.0, %v755_v48  ;;  %762 = vrcp.f32 %v431_v47 }
  0xf5   : > { %v759_v51 = vpop.eup %758  ;;  %v428_v56 = vadd.f32 1.0, %v757_v49 }
  0xf6   : > { %v761_v53 = vpop.eup %760  ;;  %v433_v55 = vadd.f32 1.0, %v759_v51  ;;  %764 = vrcp.f32 %v432_v50 }
  0xf7   : > { %v426_v58 = vadd.f32 1.0, %v761_v53 }
  0xf8   : > { %766 = vrcp.f32 %v433_v55 }
  0xf9   : > { %768 = vrcp.f32 %v430_v52 }
  0xfa   : > { %770 = vrcp.f32 %v429_v54 }
  0xfb   : > { %772 = vrcp.f32 %v428_v56 }
  0xfc   : > { %774 = vrcp.f32 %v427_v57 }
  0xfd   : > { %776 = vrcp.f32 %v426_v58 }
 0x101   : > { %v763_v59 = vpop.eup %762 }
 0x102   : > { %v455_v4 = vmul.f32 %v763_v59, %v394_v31 }
 0x103   : > { %v765_v60 = vpop.eup %764 }
 0x104   : > { %v456_v2 = vmul.f32 %v765_v60, %v398_v36 }
 0x105   : > { %v767_v61 = vpop.eup %766 }
 0x106   : > { %v769_v62 = vpop.eup %768  ;;  %v457_v63 = vmul.f32 %v767_v61, %v400_v40 }
 0x107   : > { %v771_v1 = vpop.eup %770  ;;  %v454_v6 = vmul.f32 %v769_v62, %v392_v27  ;;  %v477_v27 = vpop.permute.xlu0 %476 }
 0x108   : > { %v773_v3 = vpop.eup %772  ;;  %513 = vmatprep.subr.mxu1 %v457_v63  ;;  %v453_v8 = vmul.f32 %v771_v1, %v902_v23 }
 0x109   : > { %v775_v5 = vpop.eup %774  ;;  %514 = vmatpush1.msra.mxu1 %v456_v2  ;;  %v452_v9 = vmul.f32 %v773_v3, %v905_v28 }
 0x10a   : > { %v777_v7 = vpop.eup %776  ;;  %515 = vmatprep.subr.mxu1 %v455_v4  ;;  %v451_v10 = vmul.f32 %v775_v5, %v900_v21 }
 0x10b   : > { %516 = vmatpush1.msra.mxu1 %v454_v6  ;;  %v450_v11 = vmul.f32 %v777_v7, %v908_v32 }
 0x10c   : > { %517 = vmatprep.subr.mxu1 %v453_v8 }
 0x10d   : > { %518 = vmatpush1.msra.mxu1 %v452_v9 }
 0x10e   : > { %519 = vmatprep.subr.mxu1 %v451_v10 }
 0x10f   : > { %520 = vmatpush1.msra.mxu1 %v450_v11 }
 0x110   : > { %704 = vmatmul.mubr.msk.f32.vlgmr.msra.gmra.mxu1 %vm479_vm2, %v458_v12 }
 0x111   : > { %559 = vmatprep.mubr.f32.mxu1 %v802_v0 }
 0x114   : > { %705 = vmatmul.mubr.msk.f32.gmra.mxu1 %vm479_vm2, %v459_v13 }
 0x115   : > { %565 = vmatprep.mubr.f32.mxu1 %v802_v0 }
 0x118   : > { %706 = vmatmul.mubr.msk.f32.gmra.mxu1 %vm479_vm2, %v460_v14 }
 0x1d0   : > { %v555_v15 = vpop.f32.mrf.mxu1 }
 0x1d1   : > { %v556_v18 = vadd.f32 %v555_v15, %v467_v16 }
 0x1d2   : > { %v557_v17 = vpop.f32.mrf.mxu1 }
 0x1d3   : > { %v558_v19 = vadd.f32 %v557_v17, %v467_v16 }
 0x1d4   : > { %v561_v20 = vpop.f32.mrf.mxu1 }
 0x1d5   : > { %v713_v21 = vpack.c.bf16 %v558_v19, %v556_v18  ;;  %v562_v0 = vadd.f32 %v561_v20, %v472_v22 }
 0x1d6   : > { %v563_v23 = vpop.f32.mrf.mxu1 }
 0x1d7   : > { %592 = vst [vmem:[%s262_s11] sm:$0xff] %v713_v21  ;;  %v564_v24 = vadd.f32 %v563_v23, %v472_v22 }
 0x1d8   : > { %v567_v25 = vpop.f32.mrf.mxu1 }
 0x1d9   : > { %v714_v26 = vpack.c.bf16 %v564_v24, %v562_v0  ;;  %v568_v29 = vadd.f32 %v567_v25, %v477_v27 }
 0x1da   : > { %v569_v28 = vpop.f32.mrf.mxu1 }
 0x1db   : > { %593 = vst [vmem:[%s262_s11 + $0x8] sm:$0xff] %v714_v26  ;;  %v570_v30 = vadd.f32 %v569_v28, %v477_v27 }
 0x1dd   : > { %v715_v31 = vpack.c.bf16 %v570_v30, %v568_v29 }
 0x1df   : > { %594 = vst [vmem:[%s262_s11 + $0x10] sm:$0x11] %v715_v31 }
 0x1e0 PF: > { %s15_s20 = sadd.s32 1, %s800_s20   ;;  %s946_s18 = smov %s796_s19 }
 0x1e1   : > { %p12_p5 = scmp.ge.s32.totalorder %s15_s20, 4   ;;  %s947_s19 = smov %s949_s21 }
 0x1e3   :  { %14 = sbr.rel (!%p12_p5) target bundleno = 2 (0x2), region = 70 }

</bundles_post_ra>
